<compile_context>
chip_gen: v6e
topology: v6e:2x2x1
jax: 0.10.0
libtpu: 0.0.40
codegen_flags: <defaults>
</compile_context>

<pallas_src>
import jax
import jax.numpy as jnp
from jax.experimental import pallas as pl
from jax.experimental.pallas import tpu as pltpu

HIDDEN_UNITS = 512
_NEG_BIG = -1e30  # bias for padded output lanes -> exp underflows to exactly 0


def _mlp_kernel(x_ref, w1_ref, b1_ref, w2_ref, b2_ref, o_ref):
    # linear_1 (bf16 MXU, f32 accumulate) + bias + ReLU in f32
    x = x_ref[...].astype(jnp.bfloat16)
    h = jnp.dot(x, w1_ref[...], preferred_element_type=jnp.float32)
    h = jnp.maximum(h + b1_ref[...], 0.0)
    # linear_2 (bf16 MXU, f32 accumulate) + bias (padded lanes get -1e30)
    logits = jnp.dot(h.astype(jnp.bfloat16), w2_ref[...],
                     preferred_element_type=jnp.float32)
    logits = logits + b2_ref[...]
    # numerically stable softmax over the feature axis; padded lanes contribute 0.
    # Exact f32 reciprocal on the (tile_b, 1) denominator so rows sum to ~1.
    m = jnp.max(logits, axis=1, keepdims=True)
    e = jnp.exp(logits - m)
    denom = jnp.sum(e, axis=1, keepdims=True)
    o_ref[...] = e * (1.0 / denom)


def _choose_tile_b(B):
    # Block equal to the full batch is always legal; otherwise a 512-row tile
    # (multiple of 8 sublanes) keeps VMEM small on all of v5e/v6e/v7x.
    return B if B <= 512 else 512


def mlp_small_forward(x, w1, b1, w2, b2, tile_b=None):
    """x: [B, x_dim] f32. w1: [x_dim, H], b1: [1, H], w2: [H, y_dim], b2: [1, y_dim]."""
    B, x_dim = x.shape
    H = w1.shape[1]
    y_dim = w2.shape[1]
    y_pad = ((y_dim + 127) // 128) * 128  # lane-dense output width

    # Weights as bf16 (MXU-native); pad the second layer to a lane-dense width.
    w1b = w1.astype(jnp.bfloat16)
    b1f = b1.astype(jnp.float32)
    w2p = jnp.zeros((H, y_pad), jnp.bfloat16).at[:, :y_dim].set(
        w2.astype(jnp.bfloat16))
    b2p = jnp.full((1, y_pad), _NEG_BIG, jnp.float32).at[:, :y_dim].set(
        b2.astype(jnp.float32))

    if tile_b is None:
        tile_b = _choose_tile_b(B)
    grid = (pl.cdiv(B, tile_b),)

    out = pl.pallas_call(
        _mlp_kernel,
        out_shape=jax.ShapeDtypeStruct((B, y_pad), jnp.float32),
        grid=grid,
        in_specs=[
            pl.BlockSpec((tile_b, x_dim), lambda i: (i, 0)),   # x: batch-tiled
            pl.BlockSpec((x_dim, H), lambda i: (0, 0)),        # w1: resident
            pl.BlockSpec((1, H), lambda i: (0, 0)),            # b1: resident
            pl.BlockSpec((H, y_pad), lambda i: (0, 0)),        # w2: resident
            pl.BlockSpec((1, y_pad), lambda i: (0, 0)),        # b2: resident
        ],
        out_specs=pl.BlockSpec((tile_b, y_pad), lambda i: (i, 0)),
        compiler_params=pltpu.CompilerParams(
            dimension_semantics=("parallel",)),
    )(x, w1b, b1f, w2p, b2p)
    return out[:, :y_dim]


def init_params(key, x_dim, y_dim):
    """Deterministic init mimicking torch.nn.Linear (uniform +/- 1/sqrt(fan_in))."""
    k1, k2, k3, k4 = jax.random.split(key, 4)
    lim1 = 1.0 / (x_dim ** 0.5)
    lim2 = 1.0 / (HIDDEN_UNITS ** 0.5)
    w1 = jax.random.uniform(k1, (x_dim, HIDDEN_UNITS), jnp.float32, -lim1, lim1)
    b1 = jax.random.uniform(k2, (1, HIDDEN_UNITS), jnp.float32, -lim1, lim1)
    w2 = jax.random.uniform(k3, (HIDDEN_UNITS, y_dim), jnp.float32, -lim2, lim2)
    b2 = jax.random.uniform(k4, (1, y_dim), jnp.float32, -lim2, lim2)
    return w1, b1, w2, b2


def _reference(x, w1, b1, w2, b2):
    h = jnp.maximum(x @ w1 + b1, 0.0)
    return jax.nn.softmax(h @ w2 + b2, axis=1)


if __name__ == "__main__":
    key = jax.random.PRNGKey(0)
    k_x, k_p = jax.random.split(key)

    batch, x_dim, y_dim = 8, 32, 16
    x = jax.random.normal(k_x, (batch, x_dim), jnp.float32)
    w1, b1, w2, b2 = init_params(k_p, x_dim, y_dim)

    out = mlp_small_forward(x, w1, b1, w2, b2)
    out = jax.block_until_ready(out)

    # sanity: shape, rows of a softmax sum to ~1 (exact f32 normalization),
    # and agreement with a pure-JAX f32 reference (bf16 MXU operands).
    assert out.shape == (batch, y_dim)
    assert jnp.allclose(jnp.sum(out, axis=1), 1.0, atol=2e-3)
    ref = _reference(x, w1, b1, w2, b2)
    assert jnp.allclose(out, ref, atol=2e-2)

    print("KERNEL_OK")
</pallas_src>

<mosaic_0001>
module attributes {stable_mosaic.version = 11 : i64} {
  func.func @_mlp_kernel(%arg0: i32, %arg1: memref<8x32xf32, #tpu.memory_space<vmem>>, %arg2: memref<32x512xbf16, #tpu.memory_space<vmem>>, %arg3: memref<1x512xf32, #tpu.memory_space<vmem>>, %arg4: memref<512x128xbf16, #tpu.memory_space<vmem>>, %arg5: memref<1x128xf32, #tpu.memory_space<vmem>>, %arg6: memref<8x128xf32, #tpu.memory_space<vmem>>) attributes {dimension_semantics = [#tpu.dimension_semantics<parallel>], iteration_bounds = array<i64: 1>, scalar_prefetch = 0 : i64, scratch_operands = 0 : i64, tpu.core_type = #tpu.core_type<tc>, window_params = [{transform_indices = @transform_0, window_bounds = array<i64: 8, 32>}, {pipeline_mode = #tpu.pipeline_mode<synchronous>, transform_indices = @transform_1, window_bounds = array<i64: 32, 512>}, {pipeline_mode = #tpu.pipeline_mode<synchronous>, transform_indices = @transform_2, window_bounds = array<i64: 1, 512>}, {pipeline_mode = #tpu.pipeline_mode<synchronous>, transform_indices = @transform_3, window_bounds = array<i64: 512, 128>}, {pipeline_mode = #tpu.pipeline_mode<synchronous>, transform_indices = @transform_4, window_bounds = array<i64: 1, 128>}, {transform_indices = @transform_5, window_bounds = array<i64: 8, 128>}]} {
    %c0 = arith.constant 0 : index
    %c0_0 = arith.constant 0 : index
    %0 = vector.load %arg1[%c0, %c0_0] : memref<8x32xf32, #tpu.memory_space<vmem>>, vector<8x32xf32>
    %1 = arith.truncf %0 : vector<8x32xf32> to vector<8x32xbf16>
    %c0_1 = arith.constant 0 : index
    %c0_2 = arith.constant 0 : index
    %2 = vector.load %arg2[%c0_1, %c0_2] : memref<32x512xbf16, #tpu.memory_space<vmem>>, vector<32x512xbf16>
    %cst = arith.constant dense<0.000000e+00> : vector<8x512xf32>
    %3 = tpu.matmul %1, %2, %cst {dimension_numbers = #tpu.dot_dimension_numbers<[1], [0], [0], [1], [0, 0, 1, 1], [], []>} : vector<8x32xbf16>, vector<32x512xbf16>, vector<8x512xf32> -> vector<8x512xf32>
    %c0_3 = arith.constant 0 : index
    %c0_4 = arith.constant 0 : index
    %4 = vector.load %arg3[%c0_3, %c0_4] : memref<1x512xf32, #tpu.memory_space<vmem>>, vector<1x512xf32>
    %5 = vector.broadcast %4 : vector<1x512xf32> to vector<8x512xf32>
    %6 = arith.addf %3, %5 : vector<8x512xf32>
    %cst_5 = arith.constant 0.000000e+00 : f32
    %7 = vector.broadcast %cst_5 : f32 to vector<8x512xf32>
    %8 = arith.maximumf %6, %7 : vector<8x512xf32>
    %9 = arith.truncf %8 : vector<8x512xf32> to vector<8x512xbf16>
    %c0_6 = arith.constant 0 : index
    %c0_7 = arith.constant 0 : index
    %10 = vector.load %arg4[%c0_6, %c0_7] : memref<512x128xbf16, #tpu.memory_space<vmem>>, vector<512x128xbf16>
    %cst_8 = arith.constant dense<0.000000e+00> : vector<8x128xf32>
    %11 = tpu.matmul %9, %10, %cst_8 {dimension_numbers = #tpu.dot_dimension_numbers<[1], [0], [0], [1], [0, 0, 1, 1], [], []>} : vector<8x512xbf16>, vector<512x128xbf16>, vector<8x128xf32> -> vector<8x128xf32>
    %c0_9 = arith.constant 0 : index
    %c0_10 = arith.constant 0 : index
    %12 = vector.load %arg5[%c0_9, %c0_10] : memref<1x128xf32, #tpu.memory_space<vmem>>, vector<1x128xf32>
    %13 = vector.broadcast %12 : vector<1x128xf32> to vector<8x128xf32>
    %14 = arith.addf %11, %13 : vector<8x128xf32>
    %cst_11 = arith.constant dense<0xFF800000> : vector<8xf32>
    %15 = vector.multi_reduction <maximumf>, %14, %cst_11 [1] : vector<8x128xf32> to vector<8xf32>
    %16 = vector.shape_cast %15 : vector<8xf32> to vector<8x1xf32>
    %17 = vector.broadcast %16 : vector<8x1xf32> to vector<8x128xf32>
    %18 = arith.subf %14, %17 : vector<8x128xf32>
    %19 = math.exp %18 : vector<8x128xf32>
    %cst_12 = arith.constant dense<0.000000e+00> : vector<8xf32>
    %20 = vector.multi_reduction <add>, %19, %cst_12 [1] : vector<8x128xf32> to vector<8xf32>
    %21 = vector.shape_cast %20 : vector<8xf32> to vector<8x1xf32>
    %cst_13 = arith.constant 1.000000e+00 : f32
    %22 = vector.broadcast %cst_13 : f32 to vector<8x1xf32>
    %23 = arith.divf %22, %21 : vector<8x1xf32>
    %24 = vector.broadcast %23 : vector<8x1xf32> to vector<8x128xf32>
    %25 = arith.mulf %19, %24 : vector<8x128xf32>
    %c0_14 = arith.constant 0 : index
    %c0_15 = arith.constant 0 : index
    %26 = vector.load %arg6[%c0_14, %c0_15] : memref<8x128xf32, #tpu.memory_space<vmem>>, vector<8x128xf32>
    tpu.vector_store %arg6[%c0_14, %c0_15], %25 {strides = array<i32>} : memref<8x128xf32, #tpu.memory_space<vmem>>, vector<8x128xf32>,
    return
  }
  func.func @transform_0(%arg0: i32) -> (i32, i32) {
    %c0_i32 = arith.constant 0 : i32
    %c0_i32_0 = arith.constant 0 : i32
    return %arg0, %c0_i32 : i32, i32
  }
  func.func @transform_1(%arg0: i32) -> (i32, i32) {
    %c0_i32 = arith.constant 0 : i32
    %c0_i32_0 = arith.constant 0 : i32
    %c0_i32_1 = arith.constant 0 : i32
    return %c0_i32, %c0_i32_0 : i32, i32
  }
  func.func @transform_2(%arg0: i32) -> (i32, i32) {
    %c0_i32 = arith.constant 0 : i32
    %c0_i32_0 = arith.constant 0 : i32
    %c0_i32_1 = arith.constant 0 : i32
    return %c0_i32, %c0_i32_0 : i32, i32
  }
  func.func @transform_3(%arg0: i32) -> (i32, i32) {
    %c0_i32 = arith.constant 0 : i32
    %c0_i32_0 = arith.constant 0 : i32
    %c0_i32_1 = arith.constant 0 : i32
    return %c0_i32, %c0_i32_0 : i32, i32
  }
  func.func @transform_4(%arg0: i32) -> (i32, i32) {
    %c0_i32 = arith.constant 0 : i32
    %c0_i32_0 = arith.constant 0 : i32
    %c0_i32_1 = arith.constant 0 : i32
    return %c0_i32, %c0_i32_0 : i32, i32
  }
  func.func @transform_5(%arg0: i32) -> (i32, i32) {
    %c0_i32 = arith.constant 0 : i32
    %c0_i32_0 = arith.constant 0 : i32
    return %arg0, %c0_i32 : i32, i32
  }
}

</mosaic_0001>

<bundles_post_ra>
// kernel: tpu_custom_call.1
= control target key start
LH: loop header
LB: loop body
LE: loop exit
PB: predicated region body
PF: predicated region fallthrough
CT: control target
= control target key end

     0   :  { %10 = vsyncpa [#allocation3], 0  ;;  %s921_s0 = inlined_call_operand.hbm [shape: f32[8,32], index: 0, kind: input, shape index: {}]   ;;  %s922_s1 = inlined_call_operand.hbm [shape: bf16[32,512], index: 1, kind: input, shape index: {}]   ;;  %s923_s2 = inlined_call_operand.hbm [shape: f32[1,512], index: 2, kind: input, shape index: {}]   ;;  %s924_s3 = inlined_call_operand.hbm [shape: bf16[512,128], index: 3, kind: input, shape index: {}]   ;;  %s925_s4 = inlined_call_operand.vmem [shape: f32[1,128], index: 4, kind: input, shape index: {}]   ;;  %s926_s5 = inlined_call_operand.hbm [shape: f32[8,128], index: 5, kind: output, shape index: {}]  }
   0x1   :  { %11 = vsyncpa [#allocation6], 0 }
   0x2   :  { %12 = vsyncpa [#allocation9], 0 }
   0x3   :  { %13 = vsyncpa [#allocation4], 0  ;;  %s863_s18 = smov [#allocation5]  }
   0x4   :  { %s29_s19 = sshll.u32 %s863_s18, 4  ;;  %s30_s19 = int_to_ptr.vmem [resolvable:$true] %s29_s19 }
   0x5   :  { %s763_s20 = scalar_lea.vmem %s30_s19, 1024  ;;  %p768_p1 = scmp.lt.s32.totalorder %s30_s19, %s30_s19 }
   0x6   :  { %p764_p0 = scmp.ne.s32.totalorder %s30_s19, %s763_s20  ;;  %p769_p2 = scmp.lt.s32.totalorder %s763_s20, %s763_s20 }
   0x8   :  { %p770_p3 = por %p769_p2, %p768_p1 }
   0xa   :  { %p771_p4 = pnand %p770_p3, %p764_p0 }
   0xc   :  { %774 = shalt.err (!%p771_p4)
}
   0xd   :  { %s864_s21 = smov 256   ;;  %s865_s22 = smov 16  }
   0xe   :  { %35 = dma.hbm_to_vmem [thread:$0]  %s922_s1, 1024, %s30_s19, [#allocation6], %s864_s21, %s864_s21, %s865_s22  }
   0xf   :  { %s866_s25 = smov [#allocation2]   ;;  %s867_s27 = smov [#allocation7]  }
  0x10   :  { %s20_s26 = sshll.u32 %s866_s25, 4  ;;  %s42_s28 = sshll.u32 %s867_s27, 4  ;;  %s21_s26 = int_to_ptr.vmem [resolvable:$true] %s20_s26  ;;  %s43_s28 = int_to_ptr.vmem [resolvable:$true] %s42_s28 }
  0x11   :  { %s783_s29 = scalar_lea.vmem %s21_s26, 128  ;;  %p788_p6 = scmp.lt.s32.totalorder %s21_s26, %s21_s26 }
  0x12   :  { %p784_p5 = scmp.ne.s32.totalorder %s21_s26, %s783_s29  ;;  %p789_p7 = scmp.lt.s32.totalorder %s783_s29, %s783_s29 }
  0x14   :  { %p790_p8 = por %p789_p7, %p788_p6 }
  0x16   :  { %p791_p9 = pnand %p790_p8, %p784_p5 }
  0x18   :  { %794 = shalt.err (!%p791_p9)
}
  0x19   :  { %23 = dma.hbm_to_vmem [thread:$0]  %s921_s0, 128, %s21_s26, [#allocation3]  }
  0x1a   :  { %s803_s7 = scalar_lea.vmem %s43_s28, 64  ;;  %p808_p11 = scmp.lt.s32.totalorder %s43_s28, %s43_s28 }
  0x1b   :  { %p804_p10 = scmp.ne.s32.totalorder %s43_s28, %s803_s7  ;;  %p809_p12 = scmp.lt.s32.totalorder %s803_s7, %s803_s7 }
  0x1d   :  { %p810_p13 = por %p809_p12, %p808_p11 }
  0x1f   :  { %p811_p0 = pnand %p810_p13, %p804_p10 }
  0x21   :  { %814 = shalt.err (!%p811_p0)
}
  0x22   :  { %45 = dma.hbm_to_vmem [thread:$0]  %s923_s2, 64, %s43_s28, [#allocation6]  }
  0x23   :  { %s868_s9 = smov [#allocation8]  }
  0x24   :  { %s51_s10 = sshll.u32 %s868_s9, 4  ;;  %s52_s10 = int_to_ptr.vmem [resolvable:$true] %s51_s10 }
  0x25   :  { %s823_s11 = scalar_lea.vmem %s52_s10, 4096  ;;  %p828_p2 = scmp.lt.s32.totalorder %s52_s10, %s52_s10 }
  0x26   :  { %p824_p1 = scmp.ne.s32.totalorder %s52_s10, %s823_s11  ;;  %p829_p3 = scmp.lt.s32.totalorder %s823_s11, %s823_s11 }
  0x28   :  { %p830_p4 = por %p829_p3, %p828_p2 }
  0x2a   :  { %p831_p5 = pnand %p830_p4, %p824_p1 }
  0x2c   :  { %834 = shalt.err (!%p831_p5)
}
  0x2d   :  { %s869_s0 = smov 64   ;;  %s870_s12 = smov 4  }
  0x2e   :  { %57 = dma.hbm_to_vmem [thread:$0]  %s924_s3, 4096, %s52_s10, [#allocation9], %s869_s0, %s869_s0, %s870_s12  }
  0x2f   :  { %855 = dma.done.wait [#allocation3], 128  }
  0x30   :  { %856 = vsyncadd [#allocation3], 4294967168 }
  0x31   :  { %857 = dma.done.wait [#allocation6], 1088  }
  0x32   :  { %858 = vsyncadd [#allocation6], 4294966208 }
  0x33   :  { %859 = dma.done.wait [#allocation9], 4096  }
  0x34   :  { %860 = vsyncadd [#allocation9], 4294963200  ;;  %v871_v0 = vmov 0   ;;  %v707_v1 = vld [vmem:[#allocation5 + $0x24] ss:$16 sps:$4 sm:$0xff]   ;;  %v73_v9 = vld [vmem:[#allocation2] sm:$0xff]  ;;  %v85_v43 = vlaneseq }
  0x35   :  { %181 = vmatprep.mubr.bf16.mxu0 %v871_v0  ;;  %222 = vmatprep.mubr.bf16.mxu1 %v871_v0  ;;  %v709_v2 = vld [vmem:[#allocation5 + $0x2c] ss:$16 sps:$4 sm:$0xff]   ;;  %v711_v3 = vld [vmem:[#allocation5 + $0x20] ss:$16 sps:$4 sm:$0xff]   ;;  %v712_v4 = vld [vmem:[#allocation5 + $0x28] ss:$16 sps:$4 sm:$0xff]   ;;  %v74_v11 = vpack.c.bf16 %v73_v9, %v73_v9 }
  0x36   :  { %161 = vmatprep.subr.bf16.mxu0 %v707_v1  ;;  %202 = vmatprep.subr.bf16.mxu1 %v709_v2  ;;  %v713_v5 = vld [vmem:[#allocation5 + $0x4] ss:$16 sps:$4 sm:$0xff]   ;;  %v715_v6 = vld [vmem:[#allocation5 + $0xc] ss:$16 sps:$4 sm:$0xff]   ;;  %v717_v7 = vld [vmem:[#allocation5] ss:$16 sps:$4 sm:$0xff]  }
  0x37   :  { %162 = vmatpush1.bf16.msra.mxu0 %v711_v3  ;;  %203 = vmatpush1.bf16.msra.mxu1 %v712_v4  ;;  %v718_v8 = vld [vmem:[#allocation5 + $0x8] ss:$16 sps:$4 sm:$0xff]   ;;  %v719_v10 = vld [vmem:[#allocation8 + $0x78] sm:$0xff]   ;;  %vm145_vm0 = vcmask 261120   ;;  %v727_v19 = vld [vmem:[#allocation8 + $0x68] sm:$0xff]   ;;  %v86_v44 = vshrl.u32 %v85_v43, 7 }
  0x38   :  { %163 = vmatprep.subr.bf16.mxu0 %v713_v5  ;;  %204 = vmatprep.subr.bf16.mxu1 %v715_v6  ;;  %v720_v12 = vld [vmem:[#allocation8 + $0xf8] sm:$0xff]   ;;  %v723_v15 = vld [vmem:[#allocation8 + $0x70] sm:$0xff]   ;;  %v728_v20 = vld [vmem:[#allocation8 + $0xe8] sm:$0xff]  }
  0x39   :  { %v721_v13 = vld [vmem:[#allocation8 + $0x38] sm:$0xff]   ;;  %v724_v16 = vld [vmem:[#allocation8 + $0xf0] sm:$0xff]   ;;  %v729_v21 = vld [vmem:[#allocation8 + $0x28] sm:$0xff]   ;;  %v87_v45 = vsub.s32 0, %v86_v44  ;;  %v95_v46 = vsub.s32 2, %v86_v44  ;;  %v91_v48 = vsub.s32 1, %v86_v44 }
  0x3a   :  { %v722_v14 = vld [vmem:[#allocation8 + $0xb8] sm:$0xff]   ;;  %v725_v17 = vld [vmem:[#allocation8 + $0x30] sm:$0xff]   ;;  %v730_v22 = vld [vmem:[#allocation8 + $0xa8] sm:$0xff]   ;;  %v99_v49 = vsub.s32 3, %v86_v44 }
  0x3b   :  { %164 = vmatpush1.bf16.msra.mxu0 %v717_v7  ;;  %205 = vmatpush1.bf16.msra.mxu1 %v718_v8  ;;  %v726_v18 = vld [vmem:[#allocation8 + $0xb0] sm:$0xff]   ;;  %v731_v23 = vld [vmem:[#allocation8 + $0x60] sm:$0xff]   ;;  %v735_v27 = vld [vmem:[#allocation8 + $0x58] sm:$0xff]  }
  0x3c   :  { %653 = vmatprep.subr.bf16.mxu0 %v719_v10  ;;  %675 = vmatprep.subr.bf16.mxu1 %v720_v12  ;;  %v732_v24 = vld [vmem:[#allocation8 + $0xe0] sm:$0xff]   ;;  %v736_v28 = vld [vmem:[#allocation8 + $0xd8] sm:$0xff]   ;;  %v739_v31 = vld [vmem:[#allocation8 + $0x50] sm:$0xff]  }
  0x3d   :  { %v733_v25 = vld [vmem:[#allocation8 + $0x20] sm:$0xff]   ;;  %v737_v29 = vld [vmem:[#allocation8 + $0x18] sm:$0xff]   ;;  %v740_v32 = vld [vmem:[#allocation8 + $0xd0] sm:$0xff]  }
  0x3e   :  { %618 = vmatmul.mubr.msk.bf16.vlgmr.msra.gmra.mxu0 %vm145_vm0, %v74_v11  ;;  %619 = vmatmul.mubr.msk.bf16.vlgmr.msra.gmra.mxu1 %vm145_vm0, %v74_v11  ;;  %v734_v26 = vld [vmem:[#allocation8 + $0xa0] sm:$0xff]   ;;  %v738_v30 = vld [vmem:[#allocation8 + $0x98] sm:$0xff]   ;;  %v741_v33 = vld [vmem:[#allocation8 + $0x10] sm:$0xff]  }
  0x3f   :  { %654 = vmatpush3.bf16.msra.mxu0 %v721_v13  ;;  %676 = vmatpush3.bf16.msra.mxu1 %v722_v14  ;;  %v742_v34 = vld [vmem:[#allocation8 + $0x90] sm:$0xff]   ;;  %v743_v35 = vld [vmem:[#allocation8 + $0x48] sm:$0xff]   ;;  %v747_v39 = vld [vmem:[#allocation8 + $0x40] sm:$0xff]  }
  0x40   :  { %655 = vmatprep.subr.bf16.mxu0 %v723_v15  ;;  %677 = vmatprep.subr.bf16.mxu1 %v724_v16  ;;  %v744_v36 = vld [vmem:[#allocation8 + $0xc8] sm:$0xff]   ;;  %v748_v40 = vld [vmem:[#allocation8 + $0xc0] sm:$0xff]   ;;  %v83_v47 = vld [vmem:[#allocation7] sm:$0xf] }
  0x41   :  { %v745_v37 = vld [vmem:[#allocation8 + $0x8] sm:$0xff]   ;;  %v749_v41 = vld [vmem:[#allocation8] sm:$0xff]   ;;  %v88_v50 = vrot.slane %v83_v47, %v87_v45  ;;  %v96_v51 = vrot.slane %v83_v47, %v95_v46  ;;  %v92_v52 = vrot.slane %v83_v47, %v91_v48  ;;  %v100_v53 = vrot.slane %v83_v47, %v99_v49  ;;  %v620_v12 = vld [vmem:[%s925_s4] ss:$0 sm:$0xff]  ;;  %s872_s4 = smov [#allocation10]  }
  0x42   :  { %v746_v38 = vld [vmem:[#allocation8 + $0x88] sm:$0xff]   ;;  %v750_v42 = vld [vmem:[#allocation8 + $0x80] sm:$0xff]   ;;  %s599_s15 = sshll.u32 %s872_s4, 4  ;;  %s600_s15 = int_to_ptr.vmem [resolvable:$true] %s599_s15 }
  0x43   :  { %656 = vmatpush3.bf16.msra.mxu0 %v725_v17  ;;  %678 = vmatpush3.bf16.msra.mxu1 %v726_v18  ;;  %s835_s16 = scalar_lea.vmem %s600_s15, 128  ;;  %p840_p7 = scmp.lt.s32.totalorder %s600_s15, %s600_s15 }
  0x44   :  { %657 = vmatprep.subr.bf16.mxu0 %v727_v19  ;;  %679 = vmatprep.subr.bf16.mxu1 %v728_v20  ;;  %p836_p6 = scmp.ne.s32.totalorder %s600_s15, %s835_s16  ;;  %p841_p8 = scmp.lt.s32.totalorder %s835_s16, %s835_s16 }
  0x46   :  { %p842_p9 = por %p841_p8, %p840_p7 }
  0x47   :  { %658 = vmatpush3.bf16.msra.mxu0 %v729_v21  ;;  %680 = vmatpush3.bf16.msra.mxu1 %v730_v22 }
  0x48   :  { %659 = vmatprep.subr.bf16.mxu0 %v731_v23  ;;  %681 = vmatprep.subr.bf16.mxu1 %v732_v24  ;;  %p843_p10 = pnand %p842_p9, %p836_p6 }
  0x4b   :  { %660 = vmatpush3.bf16.msra.mxu0 %v733_v25  ;;  %682 = vmatpush3.bf16.msra.mxu1 %v734_v26 }
  0x4c   :  { %661 = vmatprep.subr.bf16.mxu0 %v735_v27  ;;  %683 = vmatprep.subr.bf16.mxu1 %v736_v28 }
  0x4f   :  { %662 = vmatpush3.bf16.msra.mxu0 %v737_v29  ;;  %684 = vmatpush3.bf16.msra.mxu1 %v738_v30 }
  0x50   :  { %663 = vmatprep.subr.bf16.mxu0 %v739_v31  ;;  %685 = vmatprep.subr.bf16.mxu1 %v740_v32 }
  0x53   :  { %664 = vmatpush3.bf16.msra.mxu0 %v741_v33  ;;  %686 = vmatpush3.bf16.msra.mxu1 %v742_v34 }
  0x54   :  { %665 = vmatprep.subr.bf16.mxu0 %v743_v35  ;;  %687 = vmatprep.subr.bf16.mxu1 %v744_v36 }
  0x57   :  { %666 = vmatpush3.bf16.msra.mxu0 %v745_v37  ;;  %688 = vmatpush3.bf16.msra.mxu1 %v746_v38 }
  0x58   :  { %667 = vmatprep.subr.bf16.mxu0 %v747_v39  ;;  %689 = vmatprep.subr.bf16.mxu1 %v748_v40 }
  0x5b   :  { %668 = vmatpush3.bf16.msra.mxu0 %v749_v41  ;;  %690 = vmatpush3.bf16.msra.mxu1 %v750_v42 }
  0xfe   :  { %v183_v54 = vpop.f32.mrf.mxu0  ;;  %v224_v55 = vpop.f32.mrf.mxu1 }
  0xff   :  { %v184_v56 = vadd.f32 %v183_v54, %v88_v50  ;;  %v225_v57 = vadd.f32 %v224_v55, %v96_v51 }
 0x100   :  { %v185_v58 = vpop.f32.mrf.mxu0  ;;  %v226_v59 = vpop.f32.mrf.mxu1 }
 0x101   :  { %v233_v60 = vmax.f32 %v225_v57, 0.0  ;;  %v186_v61 = vadd.f32 %v185_v58, %v92_v52  ;;  %v227_v62 = vadd.f32 %v226_v59, %v100_v53  ;;  %v231_v63 = vmax.f32 %v184_v56, 0.0 }
 0x102   :  { %v187_v0 = vpop.f32.mrf.mxu0  ;;  %v228_v1 = vpop.f32.mrf.mxu1 }
 0x103   :  { %v232_v2 = vmax.f32 %v186_v61, 0.0  ;;  %v234_v3 = vmax.f32 %v227_v62, 0.0  ;;  %v237_v4 = vpack.c.bf16 %v233_v60, %v233_v60  ;;  %v235_v9 = vpack.c.bf16 %v231_v63, %v231_v63 }
 0x104   :  { %v188_v5 = vpop.f32.mrf.mxu0  ;;  %v229_v6 = vpop.f32.mrf.mxu1 }
 0x105   :  { %v236_v7 = vpack.c.bf16 %v232_v2, %v232_v2  ;;  %v238_v8 = vpack.c.bf16 %v234_v3, %v234_v3 }
 0x107   :  { %534 = vmatprep.mubr.bf16.mxu0 %v236_v7  ;;  %574 = vmatprep.mubr.bf16.mxu1 %v238_v8 }
 0x108   :  { %535 = vmatmul.mubr.bf16.vlgmr.msra.gmra.mxu0 %v235_v9  ;;  %575 = vmatmul.mubr.bf16.vlgmr.msra.gmra.mxu1 %v237_v4 }
 0x1c8   :  { %v669_v10 = vpop.f32.mrf.mxu0  ;;  %v691_v11 = vpop.f32.mrf.mxu1 }
 0x1ca   :  { %v670_v13 = vpop.f32.mrf.mxu0  ;;  %v692_v14 = vpop.f32.mrf.mxu1 }
 0x1cb   :  { %v671_v15 = vadd.f32 %v670_v13, %v669_v10  ;;  %v693_v19 = vadd.f32 %v692_v14, %v691_v11 }
 0x1cc   :  { %v672_v16 = vpop.f32.mrf.mxu0  ;;  %v694_v17 = vpop.f32.mrf.mxu1 }
 0x1cd   :  { %v537_v18 = vadd.f32 %v671_v15, %v620_v12 }
 0x1ce   :  { %v673_v20 = vpop.f32.mrf.mxu0  ;;  %v695_v21 = vpop.f32.mrf.mxu1 }
 0x1cf   :  { %v577_v22 = vadd.f32 %v693_v19, %v537_v18 }
 0x1d1   :  { %582 = vmax.xlane.f32.xlu0 %v577_v22 }
 0x25a   :  { %v583_v23 = vpop.xlane.xlu0 %582 }
 0x25b   :  { %v584_v24 = vsub.f32 %v577_v22, %v583_v23 }
 0x25d   :  { %v585_v25 = vmul.f32 1.442695, %v584_v24 }
 0x25f   :  { %751 = vpow2.f32 %v585_v25 }
 0x26c   :  { %v752_v26 = vpop.eup %751 }
 0x26d   :  { %587 = vadd.xlane.f32.xlu0 %v752_v26 }
 0x2f6   :  { %v588_v27 = vpop.xlane.xlu0 %587 }
 0x2f7   :  { %753 = vrcp.f32 %v588_v27 }
 0x304   :  { %v754_v28 = vpop.eup %753 }
 0x305   :  { %v591_v29 = vmul.f32 %v754_v28, %v752_v26 }
 0x307   :  { %592 = vst [vmem:[#allocation10] sm:$0xff] %v591_v29 }
 0x308   :  { %846 = shalt.err (!%p843_p10)
}
 0x309   :  { %602 = dma.vmem_to_hbm [thread:$0]  %s600_s15, 128, %s926_s5, [#allocation4]  }
 0x30a   :  { %861 = dma.done.wait [#allocation4], 128  }
 0x30b   :  { %862 = vsyncadd [#allocation4], 4294967168 }
 0x30c   :  { %606 = vsyncpa [#allocation3], 1 }
 0x30d   :  { %607 = vsyncpa [#allocation6], 1 }
 0x30e   :  { %608 = vsyncpa [#allocation9], 1 }
 0x30f   :  { %609 = vsyncpa [#allocation4], 1 }

</bundles_post_ra>
